<compile_context>
chip_gen: v5e
topology: v5e:2x2
jax: 0.10.0
libtpu: 0.0.40
codegen_flags: <defaults>
</compile_context>

<pallas_src>
import functools
import math

import jax
import jax.numpy as jnp
from jax.experimental import pallas as pl
from jax.experimental.pallas import tpu as pltpu


def _round_up(x, m):
    return ((x + m - 1) // m) * m


def _apply_act(y, act):
    """Activation in f32. Zero-padded lanes stay zero for all of these."""
    if act == "relu":
        return jnp.maximum(y, 0.0)
    if act == "gelu":
        # torch.nn.GELU default is the exact erf form.
        return jax.nn.gelu(y, approximate=False)
    if act == "elu":
        # alpha = 1.0 (torch default); clamp before exp to avoid overflow.
        return jnp.where(y > 0.0, y, jnp.exp(jnp.minimum(y, 0.0)) - 1.0)
    if act == "leaky_relu":
        return jnp.where(y > 0.0, y, 0.01 * y)
    if act == "none":
        return y
    raise ValueError(f"unknown activation {act!r}")


# ---------------------------------------------------------------------------
# Fused kernel: whole MLP stack for one row tile.
#   refs = (x_ref, w0_ref, b0_ref, w1_ref, b1_ref, ..., o_ref)
# ---------------------------------------------------------------------------
def _fused_mlp_kernel(*refs, acts, compute_dtype):
    x_ref = refs[0]
    o_ref = refs[-1]
    wb_refs = refs[1:-1]
    n_layers = len(wb_refs) // 2

    h = x_ref[...]                              # (tm, K0) compute_dtype
    for li in range(n_layers):
        w_ref = wb_refs[2 * li]                 # (K_li, N_li) compute_dtype
        b_ref = wb_refs[2 * li + 1]             # (1, N_li) f32
        y = jnp.dot(h, w_ref[...], preferred_element_type=jnp.float32)
        y = y + b_ref[...]                      # bias add in f32
        y = _apply_act(y, acts[li])
        if li < n_layers - 1:
            h = y.astype(compute_dtype)         # feed next MXU matmul
        else:
            o_ref[...] = y.astype(o_ref.dtype)


# ---------------------------------------------------------------------------
# MlpBlock: parameter construction + forward (mirrors the PyTorch module).
# ---------------------------------------------------------------------------
def init_mlp_params(key, in_dim, hidden_dim, out_dim):
    """Deterministic nn.Linear-style init: U(-1/sqrt(fan_in), 1/sqrt(fan_in))."""
    all_dims = [in_dim] + list(hidden_dim) + [out_dim]
    params = []
    for i in range(len(all_dims) - 1):
        d_in, d_out = all_dims[i], all_dims[i + 1]
        key, kw, kb = jax.random.split(key, 3)
        bound = 1.0 / math.sqrt(d_in)
        w = jax.random.uniform(kw, (d_in, d_out), jnp.float32, -bound, bound)
        b = jax.random.uniform(kb, (d_out,), jnp.float32, -bound, bound)
        params.append((w, b))
    return params


def mlp_block_forward(x, params, activation="relu", last_act=True,
                      dropout=0.0, compute_dtype=jnp.bfloat16, tm=256):
    """Forward pass matching MlpBlock.forward (dropout=0.0 => identity)."""
    # TODO(synk): dropout > 0.0 (train-mode Bernoulli mask) not implemented;
    #             the module default is 0.0 so it is a no-op here.
    del dropout

    orig_shape = x.shape
    in_dim = orig_shape[-1]
    x2d = x.reshape(-1, in_dim)
    M = x2d.shape[0]
    n_layers = len(params)
    out_dim = params[-1][0].shape[1]

    # Per-layer activations (last layer linear if not last_act).
    acts = tuple(
        activation if (li < n_layers - 1 or last_act) else "none"
        for li in range(n_layers)
    )

    # Lane-dense padded feature dims (multiples of 128).
    dims = [in_dim] + [w.shape[1] for w, _ in params]
    dims_p = [_round_up(d, 128) for d in dims]

    # Row tile: multiple of 16 (covers bf16/f32 sublane packing); clamp for
    # small M so the padded block does not dwarf the real data.
    tm_eff = min(tm, _round_up(M, 16))
    Mp = _round_up(M, tm_eff)

    c_dtype = jnp.dtype(compute_dtype)
    csz = c_dtype.itemsize

    # Pad + cast operands (zero padding is exact: padded lanes contribute 0).
    xp = jnp.zeros((Mp, dims_p[0]), c_dtype).at[:M, :in_dim].set(
        x2d.astype(c_dtype))
    flat_wb = []
    for li, (w, b) in enumerate(params):
        kp, np_ = dims_p[li], dims_p[li + 1]
        wp = jnp.zeros((kp, np_), c_dtype).at[:w.shape[0], :w.shape[1]].set(
            w.astype(c_dtype))
        bp = jnp.zeros((1, np_), jnp.float32).at[0, :b.shape[0]].set(
            b.astype(jnp.float32))
        flat_wb += [wp, bp]

    grid = (Mp // tm_eff,)

    in_specs = [pl.BlockSpec((tm_eff, dims_p[0]), lambda i: (i, 0))]
    for li in range(n_layers):
        kp, np_ = dims_p[li], dims_p[li + 1]
        # Constant index_maps => weights/biases fetched once, kept resident.
        in_specs.append(pl.BlockSpec((kp, np_), lambda i: (0, 0)))
        in_specs.append(pl.BlockSpec((1, np_), lambda i: (0, 0)))
    out_spec = pl.BlockSpec((tm_eff, dims_p[-1]), lambda i: (i, 0))

    # VMEM budget: double-buffered x/out blocks + weights/biases + f32
    # intermediates; set the scoped limit with ~2x headroom (stays well within
    # v7x's 64 MiB physical VMEM for these tile sizes, raises the 16/32 MiB
    # default scoped limit on v5e/v6e only when needed).
    est = 2 * tm_eff * (dims_p[0] * csz + dims_p[-1] * 4)
    est += sum(2 * (dims_p[li] * dims_p[li + 1] * csz + dims_p[li + 1] * 4)
               for li in range(n_layers))
    est += 2 * tm_eff * max(dims_p) * 4
    vmem_limit = int(min(max(2 * est, 32 << 20), 112 << 20))

    flops = sum(2 * Mp * dims_p[li] * dims_p[li + 1] for li in range(n_layers))
    transc = sum(Mp * dims_p[li + 1]
                 for li in range(n_layers) if acts[li] in ("gelu", "elu"))
    bytes_accessed = (Mp * dims_p[0] * csz + Mp * dims_p[-1] * 4
                      + sum(dims_p[li] * dims_p[li + 1] * csz
                            + dims_p[li + 1] * 4 for li in range(n_layers)))

    out_p = pl.pallas_call(
        functools.partial(_fused_mlp_kernel, acts=acts, compute_dtype=c_dtype),
        out_shape=jax.ShapeDtypeStruct((Mp, dims_p[-1]), jnp.float32),
        grid_spec=pltpu.PrefetchScalarGridSpec(
            num_scalar_prefetch=0,
            grid=grid,
            in_specs=in_specs,
            out_specs=out_spec,
        ),
        compiler_params=pltpu.CompilerParams(
            dimension_semantics=("parallel",),
            vmem_limit_bytes=vmem_limit,
        ),
        cost_estimate=pl.CostEstimate(
            flops=flops,
            transcendentals=transc,
            bytes_accessed=bytes_accessed,
        ),
    )(xp, *flat_wb)

    out = out_p[:M, :out_dim]
    return out.reshape(*orig_shape[:-1], out_dim).astype(x.dtype)


# Pure-JAX reference for correctness checking (same compute dtype as kernel).
def mlp_block_reference(x, params, activation="relu", last_act=True,
                        compute_dtype=jnp.float32):
    y = x.reshape(-1, x.shape[-1])
    n = len(params)
    for li, (w, b) in enumerate(params):
        y = jnp.dot(y.astype(compute_dtype), w.astype(compute_dtype),
                    preferred_element_type=jnp.float32) + b.astype(jnp.float32)
        if li < n - 1 or last_act:
            y = _apply_act(y, activation)
    return y.reshape(*x.shape[:-1], params[-1][0].shape[1]).astype(x.dtype)


if __name__ == "__main__":
    key = jax.random.PRNGKey(0)
    k_x, k_p = jax.random.split(key)

    # Small shapes consistent with the module: batch=2, seq=8, in_dim=4.
    in_dim, hidden_dim, out_dim = 4, [32], 8
    x = jax.random.normal(k_x, (2, 8, in_dim), jnp.float32)
    params = init_mlp_params(k_p, in_dim, hidden_dim, out_dim)

    # Config 1: relu, last_act=True, bf16 MXU inputs / f32 accumulation.
    out_bf16 = jax.block_until_ready(
        mlp_block_forward(x, params, activation="relu", last_act=True,
                          compute_dtype=jnp.bfloat16))
    ref_bf16 = mlp_block_reference(x, params, activation="relu",
                                   last_act=True, compute_dtype=jnp.bfloat16)
    assert out_bf16.shape == (2, 8, out_dim), out_bf16.shape
    assert jnp.allclose(out_bf16, ref_bf16, atol=1e-3, rtol=1e-3), (
        float(jnp.max(jnp.abs(out_bf16 - ref_bf16))))

    # Config 2: elu, last_act=False (linear last layer), full f32.
    out_f32 = jax.block_until_ready(
        mlp_block_forward(x, params, activation="elu", last_act=False,
                          compute_dtype=jnp.float32))
    ref_f32 = mlp_block_reference(x, params, activation="elu",
                                  last_act=False, compute_dtype=jnp.float32)
    assert out_f32.shape == (2, 8, out_dim), out_f32.shape
    assert jnp.allclose(out_f32, ref_f32, atol=1e-4, rtol=1e-4), (
        float(jnp.max(jnp.abs(out_f32 - ref_f32))))

    print("KERNEL_OK")
</pallas_src>

<mosaic_0001>
module attributes {stable_mosaic.version = 11 : i64} {
  func.func @_fused_mlp_kernel(%arg0: i32, %arg1: memref<16x128xbf16, #tpu.memory_space<vmem>>, %arg2: memref<128x128xbf16, #tpu.memory_space<vmem>>, %arg3: memref<1x128xf32, #tpu.memory_space<vmem>>, %arg4: memref<128x128xbf16, #tpu.memory_space<vmem>>, %arg5: memref<1x128xf32, #tpu.memory_space<vmem>>, %arg6: memref<16x128xf32, #tpu.memory_space<vmem>>) attributes {dimension_semantics = [#tpu.dimension_semantics<parallel>], iteration_bounds = array<i64: 1>, scalar_prefetch = 0 : i64, scratch_operands = 0 : i64, tpu.core_type = #tpu.core_type<tc>, window_params = [{transform_indices = @transform_0, window_bounds = array<i64: 16, 128>}, {pipeline_mode = #tpu.pipeline_mode<synchronous>, transform_indices = @transform_1, window_bounds = array<i64: 128, 128>}, {pipeline_mode = #tpu.pipeline_mode<synchronous>, transform_indices = @transform_2, window_bounds = array<i64: 1, 128>}, {pipeline_mode = #tpu.pipeline_mode<synchronous>, transform_indices = @transform_3, window_bounds = array<i64: 128, 128>}, {pipeline_mode = #tpu.pipeline_mode<synchronous>, transform_indices = @transform_4, window_bounds = array<i64: 1, 128>}, {transform_indices = @transform_5, window_bounds = array<i64: 16, 128>}]} {
    %c0 = arith.constant 0 : index
    %c0_0 = arith.constant 0 : index
    %0 = vector.load %arg1[%c0, %c0_0] : memref<16x128xbf16, #tpu.memory_space<vmem>>, vector<16x128xbf16>
    %c0_1 = arith.constant 0 : index
    %c0_2 = arith.constant 0 : index
    %1 = vector.load %arg2[%c0_1, %c0_2] : memref<128x128xbf16, #tpu.memory_space<vmem>>, vector<128x128xbf16>
    %cst = arith.constant dense<0.000000e+00> : vector<16x128xf32>
    %2 = tpu.matmul %0, %1, %cst {dimension_numbers = #tpu.dot_dimension_numbers<[1], [0], [0], [1], [0, 0, 1, 1], [], []>} : vector<16x128xbf16>, vector<128x128xbf16>, vector<16x128xf32> -> vector<16x128xf32>
    %c0_3 = arith.constant 0 : index
    %c0_4 = arith.constant 0 : index
    %3 = vector.load %arg3[%c0_3, %c0_4] : memref<1x128xf32, #tpu.memory_space<vmem>>, vector<1x128xf32>
    %4 = vector.broadcast %3 : vector<1x128xf32> to vector<16x128xf32>
    %5 = arith.addf %2, %4 : vector<16x128xf32>
    %cst_5 = arith.constant 0.000000e+00 : f32
    %6 = vector.broadcast %cst_5 : f32 to vector<16x128xf32>
    %7 = arith.maximumf %5, %6 : vector<16x128xf32>
    %8 = arith.truncf %7 : vector<16x128xf32> to vector<16x128xbf16>
    %c0_6 = arith.constant 0 : index
    %c0_7 = arith.constant 0 : index
    %9 = vector.load %arg4[%c0_6, %c0_7] : memref<128x128xbf16, #tpu.memory_space<vmem>>, vector<128x128xbf16>
    %cst_8 = arith.constant dense<0.000000e+00> : vector<16x128xf32>
    %10 = tpu.matmul %8, %9, %cst_8 {dimension_numbers = #tpu.dot_dimension_numbers<[1], [0], [0], [1], [0, 0, 1, 1], [], []>} : vector<16x128xbf16>, vector<128x128xbf16>, vector<16x128xf32> -> vector<16x128xf32>
    %c0_9 = arith.constant 0 : index
    %c0_10 = arith.constant 0 : index
    %11 = vector.load %arg5[%c0_9, %c0_10] : memref<1x128xf32, #tpu.memory_space<vmem>>, vector<1x128xf32>
    %12 = vector.broadcast %11 : vector<1x128xf32> to vector<16x128xf32>
    %13 = arith.addf %10, %12 : vector<16x128xf32>
    %cst_11 = arith.constant 0.000000e+00 : f32
    %14 = vector.broadcast %cst_11 : f32 to vector<16x128xf32>
    %15 = arith.maximumf %13, %14 : vector<16x128xf32>
    %c0_12 = arith.constant 0 : index
    %c0_13 = arith.constant 0 : index
    %16 = vector.load %arg6[%c0_12, %c0_13] : memref<16x128xf32, #tpu.memory_space<vmem>>, vector<16x128xf32>
    tpu.vector_store %arg6[%c0_12, %c0_13], %15 {strides = array<i32>} : memref<16x128xf32, #tpu.memory_space<vmem>>, vector<16x128xf32>,
    return
  }
  func.func @transform_0(%arg0: i32) -> (i32, i32) {
    %c0_i32 = arith.constant 0 : i32
    %c0_i32_0 = arith.constant 0 : i32
    return %arg0, %c0_i32 : i32, i32
  }
  func.func @transform_1(%arg0: i32) -> (i32, i32) {
    %c0_i32 = arith.constant 0 : i32
    %c0_i32_0 = arith.constant 0 : i32
    %c0_i32_1 = arith.constant 0 : i32
    return %c0_i32, %c0_i32_0 : i32, i32
  }
  func.func @transform_2(%arg0: i32) -> (i32, i32) {
    %c0_i32 = arith.constant 0 : i32
    %c0_i32_0 = arith.constant 0 : i32
    %c0_i32_1 = arith.constant 0 : i32
    return %c0_i32, %c0_i32_0 : i32, i32
  }
  func.func @transform_3(%arg0: i32) -> (i32, i32) {
    %c0_i32 = arith.constant 0 : i32
    %c0_i32_0 = arith.constant 0 : i32
    %c0_i32_1 = arith.constant 0 : i32
    return %c0_i32, %c0_i32_0 : i32, i32
  }
  func.func @transform_4(%arg0: i32) -> (i32, i32) {
    %c0_i32 = arith.constant 0 : i32
    %c0_i32_0 = arith.constant 0 : i32
    %c0_i32_1 = arith.constant 0 : i32
    return %c0_i32, %c0_i32_0 : i32, i32
  }
  func.func @transform_5(%arg0: i32) -> (i32, i32) {
    %c0_i32 = arith.constant 0 : i32
    %c0_i32_0 = arith.constant 0 : i32
    return %arg0, %c0_i32 : i32, i32
  }
}

</mosaic_0001>

<bundles_post_ra>
// kernel: tpu_custom_call.1
= control target key start
LH: loop header
LB: loop body
LE: loop exit
PB: predicated region body
PF: predicated region fallthrough
CT: control target
= control target key end

     0   :  { %10 = vsyncpa [#allocation3], 0  ;;  %s520_s0 = inlined_call_operand.hbm [shape: bf16[16,128], index: 0, kind: input, shape index: {}]   ;;  %s521_s1 = inlined_call_operand.hbm [shape: bf16[128,128], index: 1, kind: input, shape index: {}]   ;;  %s522_s2 = inlined_call_operand.vmem [shape: f32[1,128], index: 2, kind: input, shape index: {}]   ;;  %s523_s3 = inlined_call_operand.hbm [shape: bf16[128,128], index: 3, kind: input, shape index: {}]   ;;  %s524_s4 = inlined_call_operand.vmem [shape: f32[1,128], index: 4, kind: input, shape index: {}]   ;;  %s525_s5 = inlined_call_operand.hbm [shape: f32[16,128], index: 5, kind: output, shape index: {}]  }
   0x1   :  { %11 = vsyncpa [#allocation6], 0 }
   0x2   :  { %12 = vsyncpa [#allocation4], 0  ;;  %s30_s20 = sshll.u32 %s521_s1, 4  ;;  %s464_s21 = smov [#allocation5]   ;;  %s31_s20 = int_to_ptr.hbm [resolvable:$true] %s30_s20 }
   0x3   :  { %s32_s22 = sshll.u32 %s464_s21, 4  ;;  %s17_s25 = sshll.u32 %s520_s0, 4  ;;  %s33_s22 = int_to_ptr.vmem [resolvable:$true] %s32_s22  ;;  %s18_s25 = int_to_ptr.hbm [resolvable:$true] %s17_s25 }
   0x4   :  { %s465_s26 = smov 64   ;;  %s466_s27 = smov 4  }
   0x5   :  { %38 = dma.hbm_to_vmem [thread:$0]  %s31_s20, 1024, %s33_s22, [#allocation6], %s465_s26, %s465_s26, %s466_s27  }
   0x6   :  { %s467_s28 = smov [#allocation2]   ;;  %s45_s7 = sshll.u32 %s523_s3, 4  ;;  %s46_s7 = int_to_ptr.hbm [resolvable:$true] %s45_s7 }
   0x7   :  { %s19_s29 = sshll.u32 %s467_s28, 4  ;;  %s468_s1 = smov [#allocation7]   ;;  %s20_s29 = int_to_ptr.vmem [resolvable:$true] %s19_s29 }
   0x8   :  { %25 = dma.hbm_to_vmem [thread:$0]  %s18_s25, 128, %s20_s29, [#allocation3], %s465_s26, %s465_s26, %s466_s27  }
   0x9   :  { %s47_s8 = sshll.u32 %s468_s1, 4  ;;  %s48_s8 = int_to_ptr.vmem [resolvable:$true] %s47_s8 }
   0xa   :  { %53 = dma.hbm_to_vmem [thread:$0]  %s46_s7, 1024, %s48_s8, [#allocation6], %s465_s26, %s465_s26, %s466_s27  }
   0xb   :  { %458 = dma.done.wait [#allocation3], 128  }
   0xc   :  { %459 = vsyncadd [#allocation3], 4294967168 }
   0xd   :  { %460 = dma.done.wait [#allocation6], 2048  }
   0xe   :  { %461 = vsyncadd [#allocation6], 4294965248  ;;  %v343_v0 = vld [vmem:[#allocation5 + $0x38] sm:$0xff]  ;;  %v342_v1 = vld [vmem:[#allocation5 + $0x30] sm:$0xff]  ;;  %s469_s11 = smov [#allocation8]   ;;  %s470_s15 = smov 128  }
   0xf   :  { %144 = vmatpush.bf16.msra.mxu0 %v343_v0  ;;  %v351_v2 = vld [vmem:[#allocation7 + $0x38] sm:$0xff]  ;;  %v350_v3 = vld [vmem:[#allocation7 + $0x30] sm:$0xff]  ;;  %v341_v4 = vld [vmem:[#allocation5 + $0x28] sm:$0xff]  ;;  %s251_s12 = sshll.u32 %s469_s11, 4  ;;  %s471_s16 = smov 8   ;;  %s252_s12 = int_to_ptr.vmem [resolvable:$true] %s251_s12 }
  0x10   :  { %229 = vmatpush.bf16.msra.mxu1 %v351_v2  ;;  %v349_v5 = vld [vmem:[#allocation7 + $0x28] sm:$0xff]  ;;  %v340_v6 = vld [vmem:[#allocation5 + $0x20] sm:$0xff]  ;;  %v339_v8 = vld [vmem:[#allocation5 + $0x18] sm:$0xff] }
  0x11   :  { %v348_v7 = vld [vmem:[#allocation7 + $0x20] sm:$0xff]  ;;  %v338_v9 = vld [vmem:[#allocation5 + $0x10] sm:$0xff]  ;;  %v337_v10 = vld [vmem:[#allocation5 + $0x8] sm:$0xff] }
  0x12   :  { %v336_v11 = vld [vmem:[#allocation5] sm:$0xff]  ;;  %v335_v12 = vld [vmem:[#allocation2] sm:$0xff]  ;;  %v346_v14 = vld [vmem:[#allocation7 + $0x10] sm:$0xff] }
  0x13   :  { %145 = vmatpush.bf16.msra.mxu0 %v342_v1  ;;  %v347_v13 = vld [vmem:[#allocation7 + $0x18] sm:$0xff]  ;;  %v345_v15 = vld [vmem:[#allocation7 + $0x8] sm:$0xff]  ;;  %v344_v16 = vld [vmem:[#allocation7] sm:$0xff] }
  0x14   :  { %230 = vmatpush.bf16.msra.mxu1 %v350_v3  ;;  %v360_v18 = vld [vmem:[%s522_s2] ss:$0 sm:$0xff]  ;;  %s253_s2 = sshll.u32 %s525_s5, 4  ;;  %s254_s2 = int_to_ptr.hbm [resolvable:$true] %s253_s2 }
  0x15   :  { %v361_v25 = vld [vmem:[%s524_s4] ss:$0 sm:$0xff] }
  0x17   :  { %146 = vmatpush.bf16.msra.mxu0 %v341_v4 }
  0x18   :  { %231 = vmatpush.bf16.msra.mxu1 %v349_v5 }
  0x1b   :  { %147 = vmatpush.bf16.msra.mxu0 %v340_v6 }
  0x1c   :  { %232 = vmatpush.bf16.msra.mxu1 %v348_v7 }
  0x1f   :  { %148 = vmatpush.bf16.msra.mxu0 %v339_v8 }
  0x20   :  { %233 = vmatpush.bf16.msra.mxu1 %v347_v13 }
  0x23   :  { %149 = vmatpush.bf16.msra.mxu0 %v338_v9 }
  0x24   :  { %234 = vmatpush.bf16.msra.mxu1 %v346_v14 }
  0x27   :  { %150 = vmatpush.bf16.msra.mxu0 %v337_v10 }
  0x28   :  { %235 = vmatpush.bf16.msra.mxu1 %v345_v15 }
  0x2b   :  { %151 = vmatpush.bf16.msra.mxu0 %v336_v11 }
  0x2c   :  { %236 = vmatpush.bf16.msra.mxu1 %v344_v16 }
  0x2e   :  { %152 = vmatmul.bf16.vlgmr.msra.gmra.mxu0 %v335_v12 }
  0xab   :  { %v153_v17 = vpop.f32.mrf.mxu0 }
  0xac   :  { %v154_v19 = vadd.f32 %v360_v18, %v153_v17 }
  0xae   :  { %v158_v22 = vmax.f32 %v154_v19, 0.0 }
  0xb3   :  { %v155_v20 = vpop.f32.mrf.mxu0 }
  0xb4   :  { %v156_v21 = vadd.f32 %v360_v18, %v155_v20 }
  0xb6   :  { %v159_v23 = vmax.f32 %v156_v21, 0.0 }
  0xb8   :  { %v160_v24 = vpack.c.bf16 %v159_v23, %v158_v22 }
  0xba   :  { %237 = vmatmul.bf16.vlgmr.msra.gmra.mxu1 %v160_v24 }
 0x137   :  { %v238_v26 = vpop.f32.mrf.mxu1 }
 0x138   :  { %v239_v27 = vadd.f32 %v361_v25, %v238_v26 }
 0x13a   :  { %v243_v28 = vmax.f32 %v239_v27, 0.0 }
 0x13c   :  { %245 = vst [vmem:[#allocation8] sm:$0xff] %v243_v28 }
 0x13f   :  { %v240_v29 = vpop.f32.mrf.mxu1 }
 0x140   :  { %v241_v30 = vadd.f32 %v361_v25, %v240_v29 }
 0x142   :  { %v244_v31 = vmax.f32 %v241_v30, 0.0 }
 0x144   :  { %246 = vst [vmem:[#allocation8 + $0x8] sm:$0xff] %v244_v31 }
 0x145   :  { %259 = dma.vmem_to_hbm [thread:$0]  %s252_s12, 256, %s254_s2, [#allocation4], %s470_s15, %s470_s15, %s471_s16  }
 0x146   :  { %462 = dma.done.wait [#allocation4], 256  }
 0x147   :  { %463 = vsyncadd [#allocation4], 4294967040 }
 0x148   :  { %264 = vsyncpa [#allocation3], 1 }
 0x149   :  { %265 = vsyncpa [#allocation6], 1 }
 0x14a   :  { %266 = vsyncpa [#allocation4], 1 }

</bundles_post_ra>
